<compile_context>
chip_gen: v7x
topology: tpu7x:2x2x1
jax: 0.10.0
libtpu: 0.0.40
codegen_flags: <defaults>
</compile_context>

<pallas_src>
import jax
import jax.numpy as jnp
from jax.experimental import pallas as pl
from jax.experimental.pallas import tpu as pltpu


# ----------------------------- Pallas kernel --------------------------------

def seg_lstm_kernel(x_ref, dec_ref, wp_ref, w_enc_ref, w_dec_ref, wre_ref,
                    b_ref, out_ref):
    """Fused patch-linear+ReLU -> encoder LSTM -> batched 1-step decoder LSTM
    -> output reprojection, for one tile of T rows of the B*C axis.

    x_ref  : (T, L)      lane-dense raw series rows (L = seq_len = N*W)
    dec_ref: (M, T, d)   month-major decoder input embeddings
    wp_ref : (L, N*d)    block-diagonal linear_patch weight
    w_*_ref: (2d, 4d)    [wih ; whh] packed LSTM weights
    wre_ref: (d, W)      linear_patch_re
    b_ref  : (6, BW)     packed [b_e, b_d, bp_tiled, bre, scale, 1-scale]
    out_ref: (M, T, W)   per-(month, row) prediction patches
    """
    T, _ = x_ref.shape
    M, _, d = dec_ref.shape
    d4 = 4 * d
    Nd = wp_ref.shape[1]
    N = Nd // d
    W = wre_ref.shape[1]

    # ---- unpack packed weights / biases (static slices, once) ----
    w_enc = w_enc_ref[...]
    wih_e, whh_e = w_enc[:d, :], w_enc[d:, :]
    w_dec = w_dec_ref[...]
    wih_d, whh_d = w_dec[:d, :], w_dec[d:, :]
    wre = wre_ref[...]
    b = b_ref[...]
    b_e = b[0:1, :d4]
    b_d = b[1:2, :d4]
    bp = b[2:3, :Nd]
    bre = b[3:4, :W]
    scale_row = b[4:5, :d4]        # 0.5 on i/f/o lanes, 1.0 on g lanes
    oms_row = b[5:6, :d4]          # 1 - scale

    # ---- patch projection + ReLU: one lane-dense matmul -> e_all (T, N*d) ---
    e_all = jnp.maximum(
        jnp.dot(x_ref[...], wp_ref[...], preferred_element_type=jnp.float32)
        + jnp.broadcast_to(bp, (T, Nd)), 0.0)

    # hoisted broadcasts (JAX does not CSE broadcast_in_dim)
    scale_e = jnp.broadcast_to(scale_row, (T, d4))
    oms_e = jnp.broadcast_to(oms_row, (T, d4))
    be_full = jnp.broadcast_to(b_e, (T, d4))

    # ---- encoder recurrence (only this loop is serial) ----
    # Static unroll: N is small here; only e_all stays resident across steps.
    # TODO(synk): for large seq_len/patch ratios switch to a partially
    # unrolled fori_loop over a step-major (N, T, d) staging buffer.
    h = jnp.zeros((T, d), jnp.float32)
    c = jnp.zeros((T, d), jnp.float32)
    for t in range(N):
        e_t = e_all[:, t * d:(t + 1) * d]
        gates = (jnp.dot(e_t, wih_e, preferred_element_type=jnp.float32)
                 + jnp.dot(h, whh_e, preferred_element_type=jnp.float32)
                 + be_full)
        # single-tanh trick: sigmoid(x) = 0.5*tanh(0.5*x) + 0.5
        act = jnp.tanh(gates * scale_e) * scale_e + oms_e
        i_g, f_g = act[:, :d], act[:, d:2 * d]
        g_g, o_g = act[:, 2 * d:3 * d], act[:, 3 * d:]
        c = f_g * c + i_g * g_g
        h = o_g * jnp.tanh(c)

    # ---- decoder: all M one-step LSTMs share (h, c) -> fully batched ----
    MT = M * T
    dec2 = dec_ref[...].reshape(MT, d)                                 # free merge
    hh = jnp.dot(h, whh_d, preferred_element_type=jnp.float32) + b_d   # (T, 4d)
    hh_rep = jnp.broadcast_to(hh, (M, T, d4)).reshape(MT, d4)
    gates = jnp.dot(dec2, wih_d, preferred_element_type=jnp.float32) + hh_rep
    scale_d = jnp.broadcast_to(scale_row, (MT, d4))
    oms_d = jnp.broadcast_to(oms_row, (MT, d4))
    act = jnp.tanh(gates * scale_d) * scale_d + oms_d
    i_g, f_g = act[:, :d], act[:, d:2 * d]
    g_g, o_g = act[:, 2 * d:3 * d], act[:, 3 * d:]
    c_rep = jnp.broadcast_to(c, (M, T, d)).reshape(MT, d)
    c_new = f_g * c_rep + i_g * g_g
    h_new = o_g * jnp.tanh(c_new)
    # dropout: identity at inference.
    yw = jnp.dot(h_new, wre, preferred_element_type=jnp.float32) + bre  # (MT, W)
    out_ref[...] = yw.reshape(M, T, W).astype(out_ref.dtype)            # free split


# ----------------------- tile / VMEM policy helpers --------------------------

def _round_up(v, m):
    return ((v + m - 1) // m) * m


def _slab_bytes(rows, cols, dtype_bytes=4):
    """f32 VMEM footprint of a (rows, cols) slab with (8, 128) tile padding."""
    return _round_up(max(rows, 1), 8) * _round_up(max(cols, 1), 128) * dtype_bytes


def _vmem_bytes_for_tile(T, N, M, W, d, bw):
    """Streamed blocks (double-buffered) + resident weights + in-kernel
    intermediates (e_all, encoder/decoder gate slabs, output slab)."""
    L, Nd, d4 = N * W, N * d, 4 * d
    streamed = 2 * (_slab_bytes(T, L)
                    + M * _slab_bytes(T, d)
                    + M * _slab_bytes(T, W))
    weights = 2 * (_slab_bytes(L, Nd) + 2 * _slab_bytes(2 * d, d4)
                   + _slab_bytes(d, W) + _slab_bytes(8, bw))
    inter = (_slab_bytes(T, Nd)                 # e_all (resident across loop)
             + 8 * _slab_bytes(T, d4)           # encoder gates/act/scale/bias
             + 5 * _slab_bytes(M * T, d4)       # decoder gates/act/scale/oms/hh
             + 8 * _slab_bytes(M * T, d)        # dec2, gate quarters, c/h slabs
             + _slab_bytes(M * T, W))           # yw
    return streamed + weights + inter


def _tpu_vmem_capacity():
    try:
        return int(pltpu.get_tpu_info().vmem_capacity_bytes)
    except Exception:
        return 64 * 1024 * 1024                 # conservative (v7x per-core)


def _has_two_tensorcores():
    """Megacore (v4/v5p) and v7x expose 2 TensorCores per device."""
    try:
        kind = jax.devices()[0].device_kind.lower()
    except Exception:
        return True                             # safe default: allow splitting
    return any(tag in kind for tag in ("v4", "v5p", "v7"))


def _pick_bc_tile(bc, bytes_fn, vmem_budget, prefer_multi):
    """Largest multiple-of-8 divisor of BC whose working set fits the budget;
    on 2-TC parts prefer >= 2 grid steps so ('parallel',) uses both cores."""
    cands = [t for t in range(8, bc + 1, 8) if bc % t == 0]
    if not cands:
        return bc                               # tiny BC: single full block
    fitting = [t for t in cands if bytes_fn(t) <= vmem_budget] or [min(cands)]
    if prefer_multi:
        multi = [t for t in fitting if bc // t >= 2]
        if multi:
            return max(multi)
    return max(fitting)


# ------------------------------ wrapper (glue) -------------------------------

def custom_embedding_seg_lstm(params, x, x_mark, y_mark, configs, output_channel):
    del x_mark  # unused by the reference forward as well
    B, L_in, C = x.shape
    W = configs['patch_len']
    d = configs['d_model']
    N = configs['seq_len'] // W
    M = configs['pred_len'] // W
    L = N * W
    BC = B * C
    P = M * W  # == pred_len
    d4 = 4 * d
    Nd = N * d

    # --- glue: lane-dense per-(b,c) series rows (BC, L) ---
    x_bc = jnp.transpose(x, (0, 2, 1)).reshape(BC, L_in)[:, :L]

    # --- glue: decoder-input embeddings, month-major (M, BC, d) ---
    idx = (y_mark[-1, :, 1] * 12).astype(jnp.int32)          # last batch row, as in torch
    month_sel = params['month_emb'][idx]                     # (M, d//2)
    chan = jnp.tile(params['channel_emb'], (B, 1))           # (BC, d//2)
    dec_mm = jnp.concatenate(
        [jnp.broadcast_to(month_sel[:, None, :], (M, BC, d // 2)),
         jnp.broadcast_to(chan[None, :, :], (M, BC, d // 2))], axis=-1)

    # --- glue: block-diagonal patch weight -> lane-dense e_all in-kernel ---
    eye_n = jnp.eye(N, dtype=jnp.float32)
    wp_bd = (eye_n[:, None, :, None] * params['wp'][None, :, None, :]
             ).reshape(L, Nd)                                 # (L, N*d)
    bp_bd = jnp.tile(params['bp'], (1, N))                    # (1, N*d)

    # --- packed weights / biases (fewer, invariant DMAs) ---
    w_enc = jnp.concatenate([params['wih_e'], params['whh_e']], axis=0)   # (2d,4d)
    w_dec = jnp.concatenate([params['wih_d'], params['whh_d']], axis=0)   # (2d,4d)

    bw = max(d4, Nd, W)
    lane = jnp.arange(d4)
    scale_row = jnp.where((lane >= 2 * d) & (lane < 3 * d), 1.0, 0.5)[None, :]
    b_pack = jnp.zeros((6, bw), jnp.float32)
    b_pack = b_pack.at[0:1, :d4].set(params['b_e'])
    b_pack = b_pack.at[1:2, :d4].set(params['b_d'])
    b_pack = b_pack.at[2:3, :Nd].set(bp_bd)
    b_pack = b_pack.at[3:4, :W].set(params['bre'])
    b_pack = b_pack.at[4:5, :d4].set(scale_row)
    b_pack = b_pack.at[5:6, :d4].set(1.0 - scale_row)

    # --- generation-aware tile and VMEM budget ---
    cap = _tpu_vmem_capacity()
    budget = int(0.70 * cap)                 # ~45 MiB of 64 (v7x), ~90 of 128 (v5e/v6e)
    bytes_fn = lambda t: _vmem_bytes_for_tile(t, N, M, W, d, bw)
    T = _pick_bc_tile(BC, bytes_fn, budget, prefer_multi=_has_two_tensorcores())
    vmem_limit = int(min(0.85 * cap, max(32 * 1024 * 1024, 2 * bytes_fn(T))))
    grid = (BC // T,)

    yw_mm = pl.pallas_call(
        seg_lstm_kernel,
        out_shape=jax.ShapeDtypeStruct((M, BC, W), jnp.float32),
        grid_spec=pltpu.PrefetchScalarGridSpec(
            num_scalar_prefetch=0,
            grid=grid,
            in_specs=[
                pl.BlockSpec((T, L), lambda i: (i, 0)),
                pl.BlockSpec((M, T, d), lambda i: (0, i, 0)),
                pl.BlockSpec((L, Nd), lambda i: (0, 0)),
                pl.BlockSpec((2 * d, d4), lambda i: (0, 0)),
                pl.BlockSpec((2 * d, d4), lambda i: (0, 0)),
                pl.BlockSpec((d, W), lambda i: (0, 0)),
                pl.BlockSpec((6, bw), lambda i: (0, 0)),
            ],
            out_specs=pl.BlockSpec((M, T, W), lambda i: (0, i, 0)),
        ),
        compiler_params=pltpu.CompilerParams(
            dimension_semantics=("parallel",),
            vmem_limit_bytes=vmem_limit),
    )(x_bc, dec_mm, wp_bd, w_enc, w_dec, params['wre'], b_pack)

    # --- glue epilogue: reorder to (B, C, P); tiny enc_in -> 1 mix + ReLU ---
    y_bcp = jnp.transpose(yw_mm, (1, 0, 2)).reshape(B, C, P)
    if output_channel == 'single':
        out = (jnp.einsum('bcp,c->bp', y_bcp, params['wdr'][:, 0])
               + params['bdr'][0, 0])
        return jnp.maximum(out, 0.0)
    return jnp.maximum(jnp.transpose(y_bcp, (0, 2, 1)), 0.0)


# ----------------------------- pure-JAX reference ----------------------------

def reference_forward(params, x, x_mark, y_mark, configs, output_channel):
    del x_mark
    B, L, C = x.shape
    W = configs['patch_len']
    d = configs['d_model']
    N = configs['seq_len'] // W
    M = configs['pred_len'] // W
    BC = B * C

    def cell(x_t, h, c, wih, whh, b):
        gates = x_t @ wih + h @ whh + b
        i = jax.nn.sigmoid(gates[:, :d])
        f = jax.nn.sigmoid(gates[:, d:2 * d])
        g = jnp.tanh(gates[:, 2 * d:3 * d])
        o = jax.nn.sigmoid(gates[:, 3 * d:])
        c = f * c + i * g
        return o * jnp.tanh(c), c

    xw = jnp.transpose(x, (0, 2, 1)).reshape(BC, N, W)
    enc = jnp.maximum(xw @ params['wp'] + params['bp'], 0.0)
    h = jnp.zeros((BC, d), jnp.float32)
    c = jnp.zeros((BC, d), jnp.float32)
    for t in range(N):
        h, c = cell(enc[:, t, :], h, c, params['wih_e'], params['whh_e'], params['b_e'])

    idx = (y_mark[-1, :, 1] * 12).astype(jnp.int32)
    month_sel = params['month_emb'][idx]
    chan = jnp.tile(params['channel_emb'], (B, 1))
    dec_emb = jnp.concatenate(
        [jnp.broadcast_to(month_sel[None], (BC, M, d // 2)),
         jnp.broadcast_to(chan[:, None, :], (BC, M, d // 2))], axis=-1)

    yw = []
    for m in range(M):
        h_m, _ = cell(dec_emb[:, m, :], h, c, params['wih_d'], params['whh_d'], params['b_d'])
        yw.append(h_m @ params['wre'] + params['bre'])
    yw = jnp.stack(yw, axis=1)                                      # (BC, M, W)
    y = jnp.transpose(yw.reshape(B, C, M * W), (0, 2, 1))           # (B, P, C)
    if output_channel == 'single':
        y = (y @ params['wdr'])[..., 0] + params['bdr'][0, 0]
    return jnp.maximum(y, 0.0)


# ----------------------------- parameter init --------------------------------

def init_params(key, configs, C):
    W = configs['patch_len']
    d = configs['d_model']
    M = configs['pred_len'] // W
    ks = jax.random.split(key, 14)
    s = 0.1

    def rnd(k, shape, scale=s):
        return jax.random.normal(k, shape, jnp.float32) * scale

    return {
        # linear_patch (patch_len -> d_model), stored (in, out)
        'wp': rnd(ks[0], (W, d)), 'bp': rnd(ks[1], (1, d)),
        # lstm_enc (combined bias = b_ih + b_hh), gate order i,f,g,o
        'wih_e': rnd(ks[2], (d, 4 * d)), 'whh_e': rnd(ks[3], (d, 4 * d)),
        'b_e': rnd(ks[4], (1, 4 * d)),
        # lstm_dec
        'wih_d': rnd(ks[5], (d, 4 * d)), 'whh_d': rnd(ks[6], (d, 4 * d)),
        'b_d': rnd(ks[7], (1, 4 * d)),
        # embeddings (torch.randn -> unit normal)
        'month_emb': jax.random.normal(ks[8], (12 * M, d // 2), jnp.float32),
        'channel_emb': jax.random.normal(ks[9], (C, d // 2), jnp.float32),
        # linear_patch_re (d_model -> patch_len)
        'wre': rnd(ks[10], (d, W)), 'bre': rnd(ks[11], (1, W)),
        # linear_patch_dr (enc_in -> 1)
        'wdr': rnd(ks[12], (C, 1)), 'bdr': rnd(ks[13], (1, 1)),
    }


# ----------------------------------- main -------------------------------------

if __name__ == "__main__":
    configs = dict(seq_len=16, pred_len=8, enc_in=4, patch_len=4,
                   d_model=32, dropout=0.1)
    output_channel = 'single'
    B, C = 2, configs['enc_in']
    M = configs['pred_len'] // configs['patch_len']

    key = jax.random.PRNGKey(0)
    kx, kxm, kym, kp = jax.random.split(key, 4)
    x = jax.random.normal(kx, (B, configs['seq_len'], C), jnp.float32)
    x_mark = jax.random.normal(kxm, (B, configs['seq_len'], 4), jnp.float32)
    months = jax.random.randint(kym, (B, M), 0, 12)
    y_mark = jnp.stack(
        [jnp.zeros((B, M)), months / 12.0, jnp.zeros((B, M)), jnp.zeros((B, M))],
        axis=-1).astype(jnp.float32)

    params = init_params(kp, configs, C)

    out = custom_embedding_seg_lstm(params, x, x_mark, y_mark, configs, output_channel)
    out = jax.block_until_ready(out)

    ref = reference_forward(params, x, x_mark, y_mark, configs, output_channel)
    assert out.shape == (B, configs['pred_len']), out.shape
    assert bool(jnp.all(jnp.isfinite(out)))
    assert bool(jnp.allclose(out, ref, atol=1e-3, rtol=1e-3)), (out, ref)
    print("KERNEL_OK")
</pallas_src>

<mosaic_0001>
module attributes {stable_mosaic.version = 11 : i64} {
  func.func @seg_lstm_kernel(%arg0: i32, %arg1: memref<8x16xf32, #tpu.memory_space<vmem>>, %arg2: memref<2x8x32xf32, #tpu.memory_space<vmem>>, %arg3: memref<16x128xf32, #tpu.memory_space<vmem>>, %arg4: memref<64x128xf32, #tpu.memory_space<vmem>>, %arg5: memref<64x128xf32, #tpu.memory_space<vmem>>, %arg6: memref<32x4xf32, #tpu.memory_space<vmem>>, %arg7: memref<6x128xf32, #tpu.memory_space<vmem>>, %arg8: memref<2x8x4xf32, #tpu.memory_space<vmem>>) attributes {dimension_semantics = [#tpu.dimension_semantics<parallel>], iteration_bounds = array<i64: 1>, scalar_prefetch = 0 : i64, scratch_operands = 0 : i64, tpu.core_type = #tpu.core_type<tc>, window_params = [{transform_indices = @transform_0, window_bounds = array<i64: 8, 16>}, {transform_indices = @transform_1, window_bounds = array<i64: 2, 8, 32>}, {pipeline_mode = #tpu.pipeline_mode<synchronous>, transform_indices = @transform_2, window_bounds = array<i64: 16, 128>}, {pipeline_mode = #tpu.pipeline_mode<synchronous>, transform_indices = @transform_3, window_bounds = array<i64: 64, 128>}, {pipeline_mode = #tpu.pipeline_mode<synchronous>, transform_indices = @transform_4, window_bounds = array<i64: 64, 128>}, {pipeline_mode = #tpu.pipeline_mode<synchronous>, transform_indices = @transform_5, window_bounds = array<i64: 32, 4>}, {pipeline_mode = #tpu.pipeline_mode<synchronous>, transform_indices = @transform_6, window_bounds = array<i64: 6, 128>}, {transform_indices = @transform_7, window_bounds = array<i64: 2, 8, 4>}]} {
    %c0 = arith.constant 0 : index
    %c0_0 = arith.constant 0 : index
    %0 = vector.load %arg4[%c0, %c0_0] : memref<64x128xf32, #tpu.memory_space<vmem>>, vector<64x128xf32>
    %1 = vector.extract_strided_slice %0 {offsets = [0, 0], sizes = [32, 128], strides = [1, 1]} : vector<64x128xf32> to vector<32x128xf32>
    %2 = vector.extract_strided_slice %0 {offsets = [32, 0], sizes = [32, 128], strides = [1, 1]} : vector<64x128xf32> to vector<32x128xf32>
    %c0_1 = arith.constant 0 : index
    %c0_2 = arith.constant 0 : index
    %3 = vector.load %arg5[%c0_1, %c0_2] : memref<64x128xf32, #tpu.memory_space<vmem>>, vector<64x128xf32>
    %4 = vector.extract_strided_slice %3 {offsets = [0, 0], sizes = [32, 128], strides = [1, 1]} : vector<64x128xf32> to vector<32x128xf32>
    %5 = vector.extract_strided_slice %3 {offsets = [32, 0], sizes = [32, 128], strides = [1, 1]} : vector<64x128xf32> to vector<32x128xf32>
    %c0_3 = arith.constant 0 : index
    %c0_4 = arith.constant 0 : index
    %6 = vector.load %arg6[%c0_3, %c0_4] : memref<32x4xf32, #tpu.memory_space<vmem>>, vector<32x4xf32>
    %c0_5 = arith.constant 0 : index
    %c0_6 = arith.constant 0 : index
    %7 = vector.load %arg7[%c0_5, %c0_6] : memref<6x128xf32, #tpu.memory_space<vmem>>, vector<6x128xf32>
    %8 = vector.extract_strided_slice %7 {offsets = [0, 0], sizes = [1, 128], strides = [1, 1]} : vector<6x128xf32> to vector<1x128xf32>
    %9 = vector.extract_strided_slice %7 {offsets = [1, 0], sizes = [1, 128], strides = [1, 1]} : vector<6x128xf32> to vector<1x128xf32>
    %10 = vector.extract_strided_slice %7 {offsets = [2, 0], sizes = [1, 128], strides = [1, 1]} : vector<6x128xf32> to vector<1x128xf32>
    %11 = vector.extract_strided_slice %7 {offsets = [3, 0], sizes = [1, 4], strides = [1, 1]} : vector<6x128xf32> to vector<1x4xf32>
    %12 = vector.extract_strided_slice %7 {offsets = [4, 0], sizes = [1, 128], strides = [1, 1]} : vector<6x128xf32> to vector<1x128xf32>
    %13 = vector.extract_strided_slice %7 {offsets = [5, 0], sizes = [1, 128], strides = [1, 1]} : vector<6x128xf32> to vector<1x128xf32>
    %c0_7 = arith.constant 0 : index
    %c0_8 = arith.constant 0 : index
    %14 = vector.load %arg1[%c0_7, %c0_8] : memref<8x16xf32, #tpu.memory_space<vmem>>, vector<8x16xf32>
    %c0_9 = arith.constant 0 : index
    %c0_10 = arith.constant 0 : index
    %15 = vector.load %arg3[%c0_9, %c0_10] : memref<16x128xf32, #tpu.memory_space<vmem>>, vector<16x128xf32>
    %cst = arith.constant dense<0.000000e+00> : vector<8x128xf32>
    %16 = tpu.matmul %14, %15, %cst {dimension_numbers = #tpu.dot_dimension_numbers<[1], [0], [0], [1], [0, 0, 1, 1], [], []>} : vector<8x16xf32>, vector<16x128xf32>, vector<8x128xf32> -> vector<8x128xf32>
    %17 = vector.shape_cast %10 : vector<1x128xf32> to vector<1x128xf32>
    %18 = vector.broadcast %17 : vector<1x128xf32> to vector<8x128xf32>
    %19 = arith.addf %16, %18 : vector<8x128xf32>
    %cst_11 = arith.constant 0.000000e+00 : f32
    %20 = vector.broadcast %cst_11 : f32 to vector<8x128xf32>
    %21 = arith.maximumf %19, %20 : vector<8x128xf32>
    %22 = vector.shape_cast %12 : vector<1x128xf32> to vector<1x128xf32>
    %23 = vector.broadcast %22 : vector<1x128xf32> to vector<8x128xf32>
    %24 = vector.shape_cast %13 : vector<1x128xf32> to vector<1x128xf32>
    %25 = vector.broadcast %24 : vector<1x128xf32> to vector<8x128xf32>
    %26 = vector.shape_cast %8 : vector<1x128xf32> to vector<1x128xf32>
    %27 = vector.broadcast %26 : vector<1x128xf32> to vector<8x128xf32>
    %cst_12 = arith.constant 0.000000e+00 : f32
    %28 = vector.broadcast %cst_12 : f32 to vector<8x32xf32>
    %cst_13 = arith.constant 0.000000e+00 : f32
    %29 = vector.broadcast %cst_13 : f32 to vector<8x32xf32>
    %30 = vector.extract_strided_slice %21 {offsets = [0, 0], sizes = [8, 32], strides = [1, 1]} : vector<8x128xf32> to vector<8x32xf32>
    %cst_14 = arith.constant dense<0.000000e+00> : vector<8x128xf32>
    %31 = tpu.matmul %30, %1, %cst_14 {dimension_numbers = #tpu.dot_dimension_numbers<[1], [0], [0], [1], [0, 0, 1, 1], [], []>} : vector<8x32xf32>, vector<32x128xf32>, vector<8x128xf32> -> vector<8x128xf32>
    %cst_15 = arith.constant dense<0.000000e+00> : vector<8x128xf32>
    %32 = tpu.matmul %28, %2, %cst_15 {dimension_numbers = #tpu.dot_dimension_numbers<[1], [0], [0], [1], [0, 0, 1, 1], [], []>} : vector<8x32xf32>, vector<32x128xf32>, vector<8x128xf32> -> vector<8x128xf32>
    %33 = arith.addf %31, %32 : vector<8x128xf32>
    %34 = arith.addf %33, %27 : vector<8x128xf32>
    %35 = arith.mulf %34, %23 : vector<8x128xf32>
    %36 = math.tanh %35 : vector<8x128xf32>
    %37 = arith.mulf %36, %23 : vector<8x128xf32>
    %38 = arith.addf %37, %25 : vector<8x128xf32>
    %39 = vector.extract_strided_slice %38 {offsets = [0, 0], sizes = [8, 32], strides = [1, 1]} : vector<8x128xf32> to vector<8x32xf32>
    %40 = vector.extract_strided_slice %38 {offsets = [0, 32], sizes = [8, 32], strides = [1, 1]} : vector<8x128xf32> to vector<8x32xf32>
    %41 = vector.extract_strided_slice %38 {offsets = [0, 64], sizes = [8, 32], strides = [1, 1]} : vector<8x128xf32> to vector<8x32xf32>
    %42 = vector.extract_strided_slice %38 {offsets = [0, 96], sizes = [8, 32], strides = [1, 1]} : vector<8x128xf32> to vector<8x32xf32>
    %43 = arith.mulf %40, %29 : vector<8x32xf32>
    %44 = arith.mulf %39, %41 : vector<8x32xf32>
    %45 = arith.addf %43, %44 : vector<8x32xf32>
    %46 = math.tanh %45 : vector<8x32xf32>
    %47 = arith.mulf %42, %46 : vector<8x32xf32>
    %48 = vector.extract_strided_slice %21 {offsets = [0, 32], sizes = [8, 32], strides = [1, 1]} : vector<8x128xf32> to vector<8x32xf32>
    %cst_16 = arith.constant dense<0.000000e+00> : vector<8x128xf32>
    %49 = tpu.matmul %48, %1, %cst_16 {dimension_numbers = #tpu.dot_dimension_numbers<[1], [0], [0], [1], [0, 0, 1, 1], [], []>} : vector<8x32xf32>, vector<32x128xf32>, vector<8x128xf32> -> vector<8x128xf32>
    %cst_17 = arith.constant dense<0.000000e+00> : vector<8x128xf32>
    %50 = tpu.matmul %47, %2, %cst_17 {dimension_numbers = #tpu.dot_dimension_numbers<[1], [0], [0], [1], [0, 0, 1, 1], [], []>} : vector<8x32xf32>, vector<32x128xf32>, vector<8x128xf32> -> vector<8x128xf32>
    %51 = arith.addf %49, %50 : vector<8x128xf32>
    %52 = arith.addf %51, %27 : vector<8x128xf32>
    %53 = arith.mulf %52, %23 : vector<8x128xf32>
    %54 = math.tanh %53 : vector<8x128xf32>
    %55 = arith.mulf %54, %23 : vector<8x128xf32>
    %56 = arith.addf %55, %25 : vector<8x128xf32>
    %57 = vector.extract_strided_slice %56 {offsets = [0, 0], sizes = [8, 32], strides = [1, 1]} : vector<8x128xf32> to vector<8x32xf32>
    %58 = vector.extract_strided_slice %56 {offsets = [0, 32], sizes = [8, 32], strides = [1, 1]} : vector<8x128xf32> to vector<8x32xf32>
    %59 = vector.extract_strided_slice %56 {offsets = [0, 64], sizes = [8, 32], strides = [1, 1]} : vector<8x128xf32> to vector<8x32xf32>
    %60 = vector.extract_strided_slice %56 {offsets = [0, 96], sizes = [8, 32], strides = [1, 1]} : vector<8x128xf32> to vector<8x32xf32>
    %61 = arith.mulf %58, %45 : vector<8x32xf32>
    %62 = arith.mulf %57, %59 : vector<8x32xf32>
    %63 = arith.addf %61, %62 : vector<8x32xf32>
    %64 = math.tanh %63 : vector<8x32xf32>
    %65 = arith.mulf %60, %64 : vector<8x32xf32>
    %66 = vector.extract_strided_slice %21 {offsets = [0, 64], sizes = [8, 32], strides = [1, 1]} : vector<8x128xf32> to vector<8x32xf32>
    %cst_18 = arith.constant dense<0.000000e+00> : vector<8x128xf32>
    %67 = tpu.matmul %66, %1, %cst_18 {dimension_numbers = #tpu.dot_dimension_numbers<[1], [0], [0], [1], [0, 0, 1, 1], [], []>} : vector<8x32xf32>, vector<32x128xf32>, vector<8x128xf32> -> vector<8x128xf32>
    %cst_19 = arith.constant dense<0.000000e+00> : vector<8x128xf32>
    %68 = tpu.matmul %65, %2, %cst_19 {dimension_numbers = #tpu.dot_dimension_numbers<[1], [0], [0], [1], [0, 0, 1, 1], [], []>} : vector<8x32xf32>, vector<32x128xf32>, vector<8x128xf32> -> vector<8x128xf32>
    %69 = arith.addf %67, %68 : vector<8x128xf32>
    %70 = arith.addf %69, %27 : vector<8x128xf32>
    %71 = arith.mulf %70, %23 : vector<8x128xf32>
    %72 = math.tanh %71 : vector<8x128xf32>
    %73 = arith.mulf %72, %23 : vector<8x128xf32>
    %74 = arith.addf %73, %25 : vector<8x128xf32>
    %75 = vector.extract_strided_slice %74 {offsets = [0, 0], sizes = [8, 32], strides = [1, 1]} : vector<8x128xf32> to vector<8x32xf32>
    %76 = vector.extract_strided_slice %74 {offsets = [0, 32], sizes = [8, 32], strides = [1, 1]} : vector<8x128xf32> to vector<8x32xf32>
    %77 = vector.extract_strided_slice %74 {offsets = [0, 64], sizes = [8, 32], strides = [1, 1]} : vector<8x128xf32> to vector<8x32xf32>
    %78 = vector.extract_strided_slice %74 {offsets = [0, 96], sizes = [8, 32], strides = [1, 1]} : vector<8x128xf32> to vector<8x32xf32>
    %79 = arith.mulf %76, %63 : vector<8x32xf32>
    %80 = arith.mulf %75, %77 : vector<8x32xf32>
    %81 = arith.addf %79, %80 : vector<8x32xf32>
    %82 = math.tanh %81 : vector<8x32xf32>
    %83 = arith.mulf %78, %82 : vector<8x32xf32>
    %84 = vector.extract_strided_slice %21 {offsets = [0, 96], sizes = [8, 32], strides = [1, 1]} : vector<8x128xf32> to vector<8x32xf32>
    %cst_20 = arith.constant dense<0.000000e+00> : vector<8x128xf32>
    %85 = tpu.matmul %84, %1, %cst_20 {dimension_numbers = #tpu.dot_dimension_numbers<[1], [0], [0], [1], [0, 0, 1, 1], [], []>} : vector<8x32xf32>, vector<32x128xf32>, vector<8x128xf32> -> vector<8x128xf32>
    %cst_21 = arith.constant dense<0.000000e+00> : vector<8x128xf32>
    %86 = tpu.matmul %83, %2, %cst_21 {dimension_numbers = #tpu.dot_dimension_numbers<[1], [0], [0], [1], [0, 0, 1, 1], [], []>} : vector<8x32xf32>, vector<32x128xf32>, vector<8x128xf32> -> vector<8x128xf32>
    %87 = arith.addf %85, %86 : vector<8x128xf32>
    %88 = arith.addf %87, %27 : vector<8x128xf32>
    %89 = arith.mulf %88, %23 : vector<8x128xf32>
    %90 = math.tanh %89 : vector<8x128xf32>
    %91 = arith.mulf %90, %23 : vector<8x128xf32>
    %92 = arith.addf %91, %25 : vector<8x128xf32>
    %93 = vector.extract_strided_slice %92 {offsets = [0, 0], sizes = [8, 32], strides = [1, 1]} : vector<8x128xf32> to vector<8x32xf32>
    %94 = vector.extract_strided_slice %92 {offsets = [0, 32], sizes = [8, 32], strides = [1, 1]} : vector<8x128xf32> to vector<8x32xf32>
    %95 = vector.extract_strided_slice %92 {offsets = [0, 64], sizes = [8, 32], strides = [1, 1]} : vector<8x128xf32> to vector<8x32xf32>
    %96 = vector.extract_strided_slice %92 {offsets = [0, 96], sizes = [8, 32], strides = [1, 1]} : vector<8x128xf32> to vector<8x32xf32>
    %97 = arith.mulf %94, %81 : vector<8x32xf32>
    %98 = arith.mulf %93, %95 : vector<8x32xf32>
    %99 = arith.addf %97, %98 : vector<8x32xf32>
    %100 = math.tanh %99 : vector<8x32xf32>
    %101 = arith.mulf %96, %100 : vector<8x32xf32>
    %c0_22 = arith.constant 0 : index
    %c0_23 = arith.constant 0 : index
    %c0_24 = arith.constant 0 : index
    %102 = vector.load %arg2[%c0_22, %c0_23, %c0_24] : memref<2x8x32xf32, #tpu.memory_space<vmem>>, vector<2x8x32xf32>
    %103 = vector.shape_cast %102 : vector<2x8x32xf32> to vector<16x32xf32>
    %cst_25 = arith.constant dense<0.000000e+00> : vector<8x128xf32>
    %104 = tpu.matmul %101, %5, %cst_25 {dimension_numbers = #tpu.dot_dimension_numbers<[1], [0], [0], [1], [0, 0, 1, 1], [], []>} : vector<8x32xf32>, vector<32x128xf32>, vector<8x128xf32> -> vector<8x128xf32>
    %105 = vector.broadcast %9 : vector<1x128xf32> to vector<8x128xf32>
    %106 = arith.addf %104, %105 : vector<8x128xf32>
    %107 = vector.shape_cast %106 : vector<8x128xf32> to vector<1x8x128xf32>
    %108 = vector.broadcast %107 : vector<1x8x128xf32> to vector<2x8x128xf32>
    %109 = vector.shape_cast %108 : vector<2x8x128xf32> to vector<16x128xf32>
    %cst_26 = arith.constant dense<0.000000e+00> : vector<16x128xf32>
    %110 = tpu.matmul %103, %4, %cst_26 {dimension_numbers = #tpu.dot_dimension_numbers<[1], [0], [0], [1], [0, 0, 1, 1], [], []>} : vector<16x32xf32>, vector<32x128xf32>, vector<16x128xf32> -> vector<16x128xf32>
    %111 = arith.addf %110, %109 : vector<16x128xf32>
    %112 = vector.shape_cast %12 : vector<1x128xf32> to vector<1x128xf32>
    %113 = vector.broadcast %112 : vector<1x128xf32> to vector<16x128xf32>
    %114 = vector.shape_cast %13 : vector<1x128xf32> to vector<1x128xf32>
    %115 = vector.broadcast %114 : vector<1x128xf32> to vector<16x128xf32>
    %116 = arith.mulf %111, %113 : vector<16x128xf32>
    %117 = math.tanh %116 : vector<16x128xf32>
    %118 = arith.mulf %117, %113 : vector<16x128xf32>
    %119 = arith.addf %118, %115 : vector<16x128xf32>
    %120 = vector.extract_strided_slice %119 {offsets = [0, 0], sizes = [16, 32], strides = [1, 1]} : vector<16x128xf32> to vector<16x32xf32>
    %121 = vector.extract_strided_slice %119 {offsets = [0, 32], sizes = [16, 32], strides = [1, 1]} : vector<16x128xf32> to vector<16x32xf32>
    %122 = vector.extract_strided_slice %119 {offsets = [0, 64], sizes = [16, 32], strides = [1, 1]} : vector<16x128xf32> to vector<16x32xf32>
    %123 = vector.extract_strided_slice %119 {offsets = [0, 96], sizes = [16, 32], strides = [1, 1]} : vector<16x128xf32> to vector<16x32xf32>
    %124 = vector.shape_cast %99 : vector<8x32xf32> to vector<1x8x32xf32>
    %125 = vector.broadcast %124 : vector<1x8x32xf32> to vector<2x8x32xf32>
    %126 = vector.shape_cast %125 : vector<2x8x32xf32> to vector<16x32xf32>
    %127 = arith.mulf %121, %126 : vector<16x32xf32>
    %128 = arith.mulf %120, %122 : vector<16x32xf32>
    %129 = arith.addf %127, %128 : vector<16x32xf32>
    %130 = math.tanh %129 : vector<16x32xf32>
    %131 = arith.mulf %123, %130 : vector<16x32xf32>
    %cst_27 = arith.constant dense<0.000000e+00> : vector<16x4xf32>
    %132 = tpu.matmul %131, %6, %cst_27 {dimension_numbers = #tpu.dot_dimension_numbers<[1], [0], [0], [1], [0, 0, 1, 1], [], []>} : vector<16x32xf32>, vector<32x4xf32>, vector<16x4xf32> -> vector<16x4xf32>
    %133 = vector.broadcast %11 : vector<1x4xf32> to vector<16x4xf32>
    %134 = arith.addf %132, %133 : vector<16x4xf32>
    %135 = vector.shape_cast %134 : vector<16x4xf32> to vector<2x8x4xf32>
    %c0_28 = arith.constant 0 : index
    %c0_29 = arith.constant 0 : index
    %c0_30 = arith.constant 0 : index
    %136 = vector.load %arg8[%c0_28, %c0_29, %c0_30] : memref<2x8x4xf32, #tpu.memory_space<vmem>>, vector<2x8x4xf32>
    tpu.vector_store %arg8[%c0_28, %c0_29, %c0_30], %135 {strides = array<i32>} : memref<2x8x4xf32, #tpu.memory_space<vmem>>, vector<2x8x4xf32>,
    return
  }
  func.func @transform_0(%arg0: i32) -> (i32, i32) {
    %c0_i32 = arith.constant 0 : i32
    %c0_i32_0 = arith.constant 0 : i32
    return %arg0, %c0_i32 : i32, i32
  }
  func.func @transform_1(%arg0: i32) -> (i32, i32, i32) {
    %c0_i32 = arith.constant 0 : i32
    %c0_i32_0 = arith.constant 0 : i32
    %c0_i32_1 = arith.constant 0 : i32
    return %c0_i32, %arg0, %c0_i32_0 : i32, i32, i32
  }
  func.func @transform_2(%arg0: i32) -> (i32, i32) {
    %c0_i32 = arith.constant 0 : i32
    %c0_i32_0 = arith.constant 0 : i32
    %c0_i32_1 = arith.constant 0 : i32
    return %c0_i32, %c0_i32_0 : i32, i32
  }
  func.func @transform_3(%arg0: i32) -> (i32, i32) {
    %c0_i32 = arith.constant 0 : i32
    %c0_i32_0 = arith.constant 0 : i32
    %c0_i32_1 = arith.constant 0 : i32
    return %c0_i32, %c0_i32_0 : i32, i32
  }
  func.func @transform_4(%arg0: i32) -> (i32, i32) {
    %c0_i32 = arith.constant 0 : i32
    %c0_i32_0 = arith.constant 0 : i32
    %c0_i32_1 = arith.constant 0 : i32
    return %c0_i32, %c0_i32_0 : i32, i32
  }
  func.func @transform_5(%arg0: i32) -> (i32, i32) {
    %c0_i32 = arith.constant 0 : i32
    %c0_i32_0 = arith.constant 0 : i32
    %c0_i32_1 = arith.constant 0 : i32
    return %c0_i32, %c0_i32_0 : i32, i32
  }
  func.func @transform_6(%arg0: i32) -> (i32, i32) {
    %c0_i32 = arith.constant 0 : i32
    %c0_i32_0 = arith.constant 0 : i32
    %c0_i32_1 = arith.constant 0 : i32
    return %c0_i32, %c0_i32_0 : i32, i32
  }
  func.func @transform_7(%arg0: i32) -> (i32, i32, i32) {
    %c0_i32 = arith.constant 0 : i32
    %c0_i32_0 = arith.constant 0 : i32
    %c0_i32_1 = arith.constant 0 : i32
    return %c0_i32, %arg0, %c0_i32_0 : i32, i32, i32
  }
}

</mosaic_0001>

<bundles_post_ra>
// kernel: tpu_custom_call.1
= control target key start
LH: loop header
LB: loop body
LE: loop exit
PB: predicated region body
PF: predicated region fallthrough
CT: control target
= control target key end

     0   :  { %12 = vsyncpa [#allocation3], 0  ;;  %s1821_s0 = inlined_call_operand.hbm [shape: f32[8,16], index: 0, kind: input, shape index: {}]   ;;  %s1822_s1 = inlined_call_operand.vmem [shape: f32[2,8,32], index: 1, kind: input, shape index: {}]   ;;  %s1823_s2 = inlined_call_operand.vmem [shape: f32[16,128], index: 2, kind: input, shape index: {}]   ;;  %s1824_s3 = inlined_call_operand.hbm [shape: f32[64,128], index: 3, kind: input, shape index: {}]   ;;  %s1825_s4 = inlined_call_operand.hbm [shape: f32[64,128], index: 4, kind: input, shape index: {}]   ;;  %s1826_s5 = inlined_call_operand.vmem [shape: f32[32,4], index: 5, kind: input, shape index: {}]   ;;  %s1827_s6 = inlined_call_operand.vmem [shape: f32[6,128], index: 6, kind: input, shape index: {}]   ;;  %s1828_s7 = inlined_call_operand.vmem [shape: f32[2,8,4], index: 7, kind: output, shape index: {}]  }
   0x1   :  { %13 = vsyncpa [#allocation5], 0  ;;  %s1543_s24 = smov [#allocation4]   ;;  %s1473_s28 = scalar_lea.hbm %s1824_s3, 1024 }
   0x2   :  { %s33_s25 = sshll.u32 %s1543_s24, 4  ;;  %p1474_p0 = scmp.ne.s32.totalorder %s1824_s3, %s1473_s28  ;;  %s34_s25 = int_to_ptr.vmem [resolvable:$true] %s33_s25 }
   0x3   :  { %p1477_p1 = scmp.lt.u32.totalorder %s1473_s28, %s1824_s3 }
   0x5   :  { %p1479_p2 = pnand %p1477_p1, %p1474_p0 }
   0x7   :  { %1482 = shalt.err (!%p1479_p2)
}
   0x8   :  { %s1483_s10 = scalar_lea.vmem %s34_s25, 1024  ;;  %p1488_p4 = scmp.lt.s32.totalorder %s34_s25, %s34_s25 }
   0x9   :  { %p1484_p3 = scmp.ne.s32.totalorder %s34_s25, %s1483_s10  ;;  %p1489_p5 = scmp.lt.s32.totalorder %s1483_s10, %s1483_s10 }
   0xb   :  { %p1490_p6 = por %p1489_p5, %p1488_p4 }
   0xd   :  { %p1491_p7 = pnand %p1490_p6, %p1484_p3 }
   0xf   :  { %1494 = shalt.err (!%p1491_p7)
}
  0x10   :  { %s1544_s11 = smov 128   ;;  %s1545_s12 = smov 8  }
  0x11   :  { %39 = dma.hbm_to_vmem [thread:$0]  %s1824_s3, 1024, %s34_s25, [#allocation5], %s1544_s11, %s1544_s11, %s1545_s12  }
  0x12   :  { %s1546_s15 = smov [#allocation2]   ;;  %s1547_s17 = smov [#allocation6]  }
  0x13   :  { %s20_s16 = sshll.u32 %s1546_s15, 4  ;;  %s45_s18 = sshll.u32 %s1547_s17, 4  ;;  %s21_s16 = int_to_ptr.vmem [resolvable:$true] %s20_s16  ;;  %s46_s18 = int_to_ptr.vmem [resolvable:$true] %s45_s18 }
  0x14   :  { %s1495_s21 = scalar_lea.hbm %s1821_s0, 128 }
  0x15   :  { %p1496_p8 = scmp.ne.s32.totalorder %s1821_s0, %s1495_s21  ;;  %p1499_p9 = scmp.lt.u32.totalorder %s1495_s21, %s1821_s0 }
  0x17   :  { %p1501_p10 = pnand %p1499_p9, %p1496_p8 }
  0x19   :  { %1504 = shalt.err (!%p1501_p10)
}
  0x1a   :  { %s1505_s3 = scalar_lea.vmem %s21_s16, 128  ;;  %p1510_p12 = scmp.lt.s32.totalorder %s21_s16, %s21_s16 }
  0x1b   :  { %p1506_p11 = scmp.ne.s32.totalorder %s21_s16, %s1505_s3  ;;  %p1511_p13 = scmp.lt.s32.totalorder %s1505_s3, %s1505_s3 }
  0x1d   :  { %p1512_p0 = por %p1511_p13, %p1510_p12 }
  0x1f   :  { %p1513_p1 = pnand %p1512_p0, %p1506_p11 }
  0x21   :  { %1516 = shalt.err (!%p1513_p1)
}
  0x22   :  { %23 = dma.hbm_to_vmem [thread:$0]  %s1821_s0, 128, %s21_s16, [#allocation3]  }
  0x23   :  { %s1517_s30 = scalar_lea.hbm %s1825_s4, 1024 }
  0x24   :  { %p1518_p2 = scmp.ne.s32.totalorder %s1825_s4, %s1517_s30  ;;  %p1521_p3 = scmp.lt.u32.totalorder %s1517_s30, %s1825_s4 }
  0x26   :  { %p1523_p4 = pnand %p1521_p3, %p1518_p2 }
  0x28   :  { %1526 = shalt.err (!%p1523_p4)
}
  0x29   :  { %s1527_s14 = scalar_lea.vmem %s46_s18, 1024  ;;  %p1532_p6 = scmp.lt.s32.totalorder %s46_s18, %s46_s18 }
  0x2a   :  { %p1528_p5 = scmp.ne.s32.totalorder %s46_s18, %s1527_s14  ;;  %p1533_p7 = scmp.lt.s32.totalorder %s1527_s14, %s1527_s14 }
  0x2c   :  { %p1534_p8 = por %p1533_p7, %p1532_p6 }
  0x2e   :  { %p1535_p9 = pnand %p1534_p8, %p1528_p5 }
  0x30   :  { %1538 = shalt.err (!%p1535_p9)
}
  0x31   :  { %51 = dma.hbm_to_vmem [thread:$0]  %s1825_s4, 1024, %s46_s18, [#allocation5], %s1544_s11, %s1544_s11, %s1545_s12  }
  0x32   :  { %1539 = dma.done.wait [#allocation3], 128  }
  0x33   :  { %1540 = vsyncadd [#allocation3], 4294967168 }
  0x34   :  { %1541 = dma.done.wait [#allocation5], 2048  }
  0x35   :  { %1542 = vsyncadd [#allocation5], 4294965248  ;;  %v1548_v0 = vmov 0.0|0.0   ;;  %vm1549_vm0 = vmmov 0   ;;  %v1550_v1 = vmov 0.0   ;;  %v87_v2 = vld [vmem:[%s1823_s2] sm:$0xff]  ;;  %v89_v18 = vlaneseq }
  0x36   :  { %1365 = vmatprep.subr.bf16.mxu0 %v1548_v0  ;;  %1241 = vmatprep.mubr.msk.f32.mxu0 %vm1549_vm0, %v1550_v1  ;;  %v88_v3 = vld [vmem:[%s1823_s2 + $0x8] sm:$0xff]  ;;  %v70_v6 = vld [vmem:[#allocation4 + $0x28] sm:$0xff]  ;;  %v86_v10 = vld [vmem:[#allocation2] sm:$0xff]  ;;  %vm93_vm1 = vcmask 130048   ;;  %vm180_vm2 = vcmask 261120   ;;  %s1552_s18 = smov 32  }
  0x37   :  { %1368 = vmatprep.subr.bf16.mxu1 %v1548_v0  ;;  %1252 = vmatprep.mubr.msk.f32.mxu1 %vm1549_vm0, %v1550_v1  ;;  %v1366_v4 = vpack.c.bf16 %v88_v3, %v87_v2  ;;  %v69_v5 = vld [vmem:[#allocation4 + $0x20] sm:$0xff]  ;;  %v66_v9 = vld [vmem:[#allocation4 + $0x8] sm:$0xff]  ;;  %v71_v12 = vld [vmem:[#allocation4 + $0x30] sm:$0xff]  ;;  %v1674_v19 = vshrl.u32 %v89_v18, 7  ;;  %s1553_s19 = smov 96   ;;  %vm1155_vm3 = vcmask 31744  }
  0x38   :  { %v65_v7 = vld [vmem:[#allocation4] sm:$0xff]  ;;  %v1648_v8 = vpack.c.bf16 %v70_v6, %v69_v5  ;;  %v72_v13 = vld [vmem:[#allocation4 + $0x38] sm:$0xff]  ;;  %v67_v15 = vld [vmem:[#allocation4 + $0x10] sm:$0xff] }
  0x39   :  { %1367 = vmatpush3.bf16.msra.mxu0 %v1366_v4  ;;  %v1650_v11 = vpack.c.bf16 %v66_v9, %v65_v7  ;;  %v1659_v14 = vpack.c.bf16 %v72_v13, %v71_v12  ;;  %v68_v16 = vld [vmem:[#allocation4 + $0x18] sm:$0xff]  ;;  %v91_v20 = vsub.s32 2, %v1674_v19  ;;  %v178_v29 = vsub.s32 0, %v1674_v19 }
  0x3a   :  { %1370 = vmatpush3.bf16.msra.mxu1 %v1648_v8  ;;  %1374 = vmatprep.subr.bf16.mxu0 %v1548_v0  ;;  %v1661_v17 = vpack.c.bf16 %v68_v16, %v67_v15  ;;  %v1680_v21 = vld [vmem:[%s1827_s6] sm:$0x3f]  ;;  %v170_v30 = vsub.s32 4, %v1674_v19  ;;  %v174_v38 = vsub.s32 5, %v1674_v19  ;;  %s1551_s6 = smov 64  }
  0x3b   :  { %1371 = vmatprep.subr.bf16.mxu1 %v1548_v0  ;;  %v92_v22 = vrot.slane %v1680_v21, %v91_v20  ;;  %v1696_v31 = vrot.slane %v1680_v21, %v178_v29 }
  0x3c   :  { %1242 = vmatmul.mubr.msk.f32.vlgmr.msra.gmra.mrb[0].mxu0 %vm93_vm1, %v86_v10  ;;  %v1699_v33 = vrot.slane %v1680_v21, %v170_v30  ;;  %v1705_v39 = vrot.slane %v1680_v21, %v174_v38 }
  0x3d   :  { %1376 = vmatpush3.bf16.msra.mxu0 %v1650_v11  ;;  %1263 = vmatprep.mubr.msk.f32.mxu0 %vm1549_vm0, %v1550_v1 }
  0x3e   :  { %1377 = vmatprep.subr.bf16.mxu0 %v1548_v0  ;;  %1373 = vmatpush3.bf16.msra.mxu1 %v1659_v14 }
  0x3f   :  { %1380 = vmatprep.subr.bf16.mxu1 %v1548_v0 }
  0x41   :  { %1379 = vmatpush3.bf16.msra.mxu0 %v1661_v17  ;;  %1253 = vmatmul.mubr.f32.vlgmr.msra.gmra.mrb[0].mxu1 %v1550_v1 }
  0x42   :  { %1386 = vmatprep.subr.bf16.mxu0 %v1548_v0  ;;  %1382 = vmatpush3.bf16.msra.mxu1 %v1648_v8 }
  0x43   :  { %1274 = vmatprep.mubr.msk.f32.mxu1 %vm1549_vm0, %v1550_v1  ;;  %1383 = vmatprep.subr.bf16.mxu1 %v1548_v0 }
  0x46   :  { %1385 = vmatpush3.bf16.msra.mxu1 %v1659_v14 }
  0x47   :  { %1392 = vmatprep.subr.bf16.mxu1 %v1548_v0 }
 0x10f   :  { %v163_v23 = vpop.f32.mrb[0].mxu0 }
 0x110   :  { %v164_v24 = vadd.f32 %v163_v23, %v92_v22  ;;  %v1243_v25 = vpop.f32.mrb[1].mxu0 }
 0x112   :  { %v1683_v26 = vmax.f32 %v164_v24, 0.0 }
 0x114   :  { %1264 = vmatmul.mubr.msk.f32.vlgmr.msra.gmra.mrb[2].mxu0 %vm180_vm2, %v1683_v26  ;;  %v250_v27 = vpop.f32.mrb[0].mxu1 }
 0x115   :  { %1388 = vmatpush3.bf16.msra.mxu0 %v1650_v11  ;;  %1285 = vmatprep.mubr.msk.f32.mxu0 %vm1549_vm0, %v1550_v1  ;;  %v1254_v28 = vpop.f32.mrb[1].mxu1 }
 0x116   :  { %1389 = vmatprep.subr.bf16.mxu0 %v1548_v0 }
 0x119   :  { %1391 = vmatpush3.bf16.msra.mxu0 %v1661_v17 }
 0x11a   :  { %1398 = vmatprep.subr.bf16.mxu0 %v1548_v0 }
 0x1e7   :  { %v323_v32 = vpop.f32.mrb[2].mxu0 }
 0x1e8   :  { %v324_v34 = vadd.f32 %v323_v32, %v250_v27  ;;  %v1265_v35 = vpop.f32.mrb[3].mxu0 }
 0x1ea   :  { %v327_v36 = vadd.f32 %v324_v34, %v1696_v31 }
 0x1ec   :  { %v328_v37 = vmul.f32 %v327_v36, %v1699_v33 }
 0x1ee   :  { %1449 = vtanh.f32 %v328_v37 }
 0x1f8   :  { %v1450_v40 = vpop.eup %1449 }
 0x1f9   :  { %v330_v41 = vmul.f32 %v1450_v40, %v1699_v33 }
 0x1fb   :  { %v331_v42 = vadd.f32 %v330_v41, %v1705_v39 }
 0x1fd   :  { %334 = vrot.lane.b32.xlu0 %v331_v42, %s1551_s6  ;;  %v332_v45 = vmul.f32 0.0, %v331_v42 }
 0x26f   :  { %v335_v43 = vpop.permute.xlu0 %334 }
 0x270   :  { %v337_v44 = vmul.f32 %v335_v43, %v331_v42 }
 0x272   :  { %339 = vrot.lane.b32.xlu0 %v337_v44, %s1552_s18 }
 0x276   :  { %424 = vrot.lane.b32.xlu0 %v1683_v26, %s1553_s19 }
 0x2e4   :  { %v340_v46 = vpop.permute.xlu0 %339 }
 0x2e5   :  { %v342_v47 = vadd.f32 %v340_v46, %v332_v45 }
 0x2e7   :  { %1451 = vtanh.f32 %v342_v47 }
 0x2e8   :  { %v425_v48 = vpop.permute.xlu0 %424 }
 0x2e9   :  { %1286 = vmatmul.mubr.msk.f32.vlgmr.msra.gmra.mrb[4].mxu0 %vm180_vm2, %v425_v48 }
 0x2ea   :  { %1400 = vmatpush3.bf16.msra.mxu0 %v1650_v11  ;;  %1307 = vmatprep.mubr.msk.f32.mxu0 %vm1549_vm0, %v1550_v1 }
 0x2eb   :  { %1401 = vmatprep.subr.bf16.mxu0 %v1548_v0 }
 0x2ee   :  { %1403 = vmatpush3.bf16.msra.mxu0 %v1661_v17 }
 0x2ef   :  { %1410 = vmatprep.subr.bf16.mxu0 %v1548_v0 }
 0x2f1   :  { %v1452_v49 = vpop.eup %1451 }
 0x2f2   :  { %345 = vrot.lane.b32.xlu1 %v1452_v49, %s1551_s6 }
 0x364   :  { %v346_v50 = vpop.permute.xlu1 %345 }
 0x365   :  { %v348_v51 = vmul.f32 %v346_v50, %v331_v42  ;;  %v73_v50 = vld [vmem:[#allocation6] sm:$0xff] }
 0x367   :  { %350 = vrot.lane.b32.xlu1 %v348_v51, %s1552_s18  ;;  %v77_v51 = vld [vmem:[#allocation6 + $0x20] sm:$0xff] }
 0x3bc   :  { %v494_v52 = vpop.f32.mrb[4].mxu0 }
 0x3bd   :  { %v1287_v53 = vpop.f32.mrb[5].mxu0 }
 0x3be   :  { %v78_v53 = vld [vmem:[#allocation6 + $0x28] sm:$0xff] }
 0x3d9   :  { %v351_v54 = vpop.permute.xlu1 %350 }
 0x3da   :  { %1275 = vmatmul.mubr.msk.f32.vlgmr.msra.gmra.mrb[2].mxu1 %vm180_vm2, %v351_v54  ;;  %v75_v54 = vld [vmem:[#allocation6 + $0x10] sm:$0xff] }
 0x3db   :  { %1394 = vmatpush3.bf16.msra.mxu1 %v1648_v8  ;;  %1296 = vmatprep.mubr.msk.f32.mxu1 %vm1549_vm0, %v1550_v1 }
 0x3dc   :  { %1395 = vmatprep.subr.bf16.mxu1 %v1548_v0 }
 0x3df   :  { %1397 = vmatpush3.bf16.msra.mxu1 %v1659_v14 }
 0x3e0   :  { %1404 = vmatprep.subr.bf16.mxu1 %v1548_v0 }
 0x4ad   :  { %v420_v55 = vpop.f32.mrb[2].mxu1 }
 0x4ae   :  { %v495_v56 = vadd.f32 %v494_v52, %v420_v55  ;;  %v1276_v57 = vpop.f32.mrb[3].mxu1  ;;  %v76_v55 = vld [vmem:[#allocation6 + $0x18] sm:$0xff] }
 0x4af   :  { %v1426_v57 = vpack.c.bf16 %v76_v55, %v75_v54 }
 0x4b0   :  { %v498_v58 = vadd.f32 %v495_v56, %v1696_v31  ;;  %v1417_v56 = vpack.c.bf16 %v78_v53, %v77_v51 }
 0x4b2   :  { %v499_v59 = vmul.f32 %v498_v58, %v1699_v33  ;;  %v79_v58 = vld [vmem:[#allocation6 + $0x30] sm:$0xff] }
 0x4b4   :  { %1453 = vtanh.f32 %v499_v59  ;;  %v80_v59 = vld [vmem:[#allocation6 + $0x38] sm:$0xff] }
 0x4be   :  { %v1454_v60 = vpop.eup %1453 }
 0x4bf   :  { %v501_v61 = vmul.f32 %v1454_v60, %v1699_v33  ;;  %v862_v60 = vld [vmem:[%s1822_s1] sm:$0xff] }
 0x4c1   :  { %v502_v62 = vadd.f32 %v501_v61, %v1705_v39  ;;  %v1420_v61 = vpack.c.bf16 %v80_v59, %v79_v58 }
 0x4c3   :  { %505 = vrot.lane.b32.xlu1 %v502_v62, %s1551_s6  ;;  %v503_v3 = vmul.f32 %v502_v62, %v342_v47 }
 0x535   :  { %v506_v63 = vpop.permute.xlu1 %505 }
 0x536   :  { %v508_v2 = vmul.f32 %v506_v63, %v502_v62  ;;  %v863_v63 = vld [vmem:[%s1822_s1 + $0x8] sm:$0xff] }
 0x538   :  { %510 = vrot.lane.b32.xlu0 %v508_v2, %s1552_s18 }
 0x5aa   :  { %v511_v4 = vpop.permute.xlu0 %510 }
 0x5ab   :  { %v513_v5 = vadd.f32 %v511_v4, %v503_v3 }
 0x5ad   :  { %1455 = vtanh.f32 %v513_v5 }
 0x5b7   :  { %v1456_v6 = vpop.eup %1455 }
 0x5b8   :  { %516 = vrot.lane.b32.xlu1 %v1456_v6, %s1551_s6  ;;  %v866_v6 = vsub.s32 1, %v1674_v19 }
 0x5bc   :  { %595 = vrot.lane.b32.xlu1 %v1683_v26, %s1551_s6 }
 0x62a   :  { %v517_v7 = vpop.permute.xlu1 %516 }
 0x62b   :  { %v519_v9 = vmul.f32 %v517_v7, %v502_v62  ;;  %v867_v7 = vrot.slane %v1680_v21, %v866_v6 }
 0x62d   :  { %521 = vrot.lane.b32.xlu0 %v519_v9, %s1552_s18 }
 0x62e   :  { %v596_v10 = vpop.permute.xlu1 %595 }
 0x62f   :  { %1308 = vmatmul.mubr.msk.f32.vlgmr.msra.gmra.mrb[6].mxu0 %vm180_vm2, %v596_v10 }
 0x630   :  { %1412 = vmatpush3.bf16.msra.mxu0 %v1650_v11  ;;  %1329 = vmatprep.mubr.msk.f32.mxu0 %vm1549_vm0, %v1550_v1 }
 0x631   :  { %1413 = vmatprep.subr.bf16.mxu0 %v1548_v0 }
 0x634   :  { %1415 = vmatpush3.bf16.msra.mxu0 %v1661_v17 }
 0x69f   :  { %v522_v12 = vpop.permute.xlu0 %521 }
 0x6a0   :  { %1297 = vmatmul.mubr.msk.f32.vlgmr.msra.gmra.mrb[4].mxu1 %vm180_vm2, %v522_v12 }
 0x6a1   :  { %1406 = vmatpush3.bf16.msra.mxu1 %v1648_v8  ;;  %1318 = vmatprep.mubr.msk.f32.mxu1 %vm1549_vm0, %v1550_v1 }
 0x6a2   :  { %1407 = vmatprep.subr.bf16.mxu1 %v1548_v0 }
 0x6a5   :  { %1409 = vmatpush3.bf16.msra.mxu1 %v1659_v14 }
 0x6a6   :  { %1416 = vmatprep.subr.bf16.mxu1 %v1548_v0 }
 0x702   :  { %v665_v11 = vpop.f32.mrb[6].mxu0 }
 0x703   :  { %v1309_v13 = vpop.f32.mrb[7].mxu0 }
 0x773   :  { %v591_v15 = vpop.f32.mrb[4].mxu1 }
 0x774   :  { %v666_v16 = vadd.f32 %v665_v11, %v591_v15  ;;  %v1298_v18 = vpop.f32.mrb[5].mxu1 }
 0x776   :  { %v669_v17 = vadd.f32 %v666_v16, %v1696_v31 }
 0x778   :  { %v670_v20 = vmul.f32 %v669_v17, %v1699_v33 }
 0x77a   :  { %1457 = vtanh.f32 %v670_v20 }
 0x784   :  { %v1458_v8 = vpop.eup %1457 }
 0x785   :  { %v672_v22 = vmul.f32 %v1458_v8, %v1699_v33 }
 0x787   :  { %v673_v23 = vadd.f32 %v672_v22, %v1705_v39 }
 0x789   :  { %676 = vrot.lane.b32.xlu0 %v673_v23, %s1551_s6  ;;  %v674_v25 = vmul.f32 %v673_v23, %v513_v5 }
 0x7fb   :  { %v677_v14 = vpop.permute.xlu0 %676 }
 0x7fc   :  { %v679_v24 = vmul.f32 %v677_v14, %v673_v23 }
 0x7fe   :  { %681 = vrot.lane.b32.xlu1 %v679_v24, %s1552_s18 }
 0x870   :  { %v682_v27 = vpop.permute.xlu1 %681 }
 0x871   :  { %v684_v28 = vadd.f32 %v682_v27, %v674_v25 }
 0x873   :  { %1459 = vtanh.f32 %v684_v28 }
 0x87d   :  { %v1460_v29 = vpop.eup %1459 }
 0x87e   :  { %687 = vrot.lane.b32.xlu0 %v1460_v29, %s1551_s6 }
 0x882   :  { %766 = vrot.lane.b32.xlu0 %v1683_v26, %s1552_s18 }
 0x8f0   :  { %v688_v30 = vpop.permute.xlu0 %687 }
 0x8f1   :  { %v690_v32 = vmul.f32 %v688_v30, %v673_v23 }
 0x8f3   :  { %692 = vrot.lane.b32.xlu1 %v690_v32, %s1552_s18 }
 0x8f4   :  { %v767_v34 = vpop.permute.xlu0 %766 }
 0x8f5   :  { %1330 = vmatmul.mubr.msk.f32.vlgmr.msra.gmra.mrb[8].mxu0 %vm180_vm2, %v767_v34 }
 0x8f6   :  { %1351 = vmatprep.mubr.msk.f32.mxu0 %vm180_vm2, %v862_v60 }
 0x965   :  { %v693_v35 = vpop.permute.xlu1 %692 }
 0x966   :  { %1319 = vmatmul.mubr.msk.f32.vlgmr.msra.gmra.mrb[6].mxu1 %vm180_vm2, %v693_v35  ;;  %v82_v35 = vld [vmem:[%s1826_s5 + $0x8] sm:$0xff] }
 0x967   :  { %1340 = vmatprep.mubr.msk.f32.mxu1 %vm1549_vm0, %v1550_v1  ;;  %1418 = vmatpush3.bf16.msra.mxu1 %v1417_v56 }
 0x968   :  { %1419 = vmatprep.subr.bf16.mxu1 %v1548_v0 }
 0x96b   :  { %1421 = vmatpush3.bf16.msra.mxu1 %v1420_v61 }
 0x9c8   :  { %v836_v36 = vpop.f32.mrb[8].mxu0 }
 0x9c9   :  { %v1331_v37 = vpop.f32.mrb[9].mxu0 }
 0xa39   :  { %v762_v38 = vpop.f32.mrb[6].mxu1 }
 0xa3a   :  { %v837_v40 = vadd.f32 %v836_v36, %v762_v38  ;;  %v1320_v41 = vpop.f32.mrb[7].mxu1  ;;  %v83_v36 = vld [vmem:[%s1826_s5 + $0x10] sm:$0xff]  ;;  %v84_v38 = vld [vmem:[%s1826_s5 + $0x18] sm:$0xff] }
 0xa3c   :  { %v840_v26 = vadd.f32 %v837_v40, %v1696_v31  ;;  %v74_v31 = vld [vmem:[#allocation6 + $0x8] sm:$0xff]  ;;  %v1434_v40 = vpack.c.bf16 %v84_v38, %v83_v36 }
 0xa3d   :  { %v1422_v52 = vpack.c.bf16 %v74_v31, %v73_v50 }
 0xa3e   :  { %v841_v42 = vmul.f32 %v840_v26, %v1699_v33 }
 0xa3f   :  { %1423 = vmatprep.subr.bf16.mxu0 %v1422_v52 }
 0xa40   :  { %1461 = vtanh.f32 %v841_v42  ;;  %1425 = vmatpush3.bf16.msra.mxu0 %v1422_v52 }
 0xa41   :  { %1427 = vmatprep.subr.bf16.mxu0 %v1426_v57 }
 0xa44   :  { %1429 = vmatpush3.bf16.msra.mxu0 %v1426_v57 }
 0xa47   :  { %1352 = vmatmul.mubr.msk.f32.vlgmr.msra.gmra.mrb[10].mxu0 %vm180_vm2, %v863_v63 }
 0xa4a   :  { %v1462_v43 = vpop.eup %1461 }
 0xa4b   :  { %v843_v44 = vmul.f32 %v1462_v43, %v1699_v33 }
 0xa4d   :  { %v844_v45 = vadd.f32 %v843_v44, %v1705_v39 }
 0xa4f   :  { %847 = vrot.lane.b32.xlu1 %v844_v45, %s1551_s6  ;;  %v845_v1 = vmul.f32 %v844_v45, %v684_v28 }
 0xac1   :  { %v848_v46 = vpop.permute.xlu1 %847 }
 0xac2   :  { %v850_v47 = vmul.f32 %v848_v46, %v844_v45 }
 0xac4   :  { %852 = vrot.lane.b32.xlu0 %v850_v47, %s1552_s18 }
 0xb1a   :  { %v1353_v0 = vpop.f32.mrb[10].mxu0 }
 0xb1b   :  { %v1015_v5 = vpop.f32.mrb[11].mxu0 }
 0xb36   :  { %v853_v48 = vpop.permute.xlu0 %852 }
 0xb37   :  { %v855_v49 = vadd.f32 %v853_v48, %v845_v1  ;;  %v1068_v1 = vsub.s32 3, %v1674_v19 }
 0xb39   :  { %1463 = vtanh.f32 %v855_v49  ;;  %v1069_v48 = vrot.slane %v1680_v21, %v1068_v1 }
 0xb43   :  { %v1464_v62 = vpop.eup %1463 }
 0xb44   :  { %858 = vrot.lane.b32.xlu1 %v1464_v62, %s1551_s6 }
 0xbb6   :  { %v859_v2 = vpop.permute.xlu1 %858 }
 0xbb7   :  { %v861_v3 = vmul.f32 %v859_v2, %v844_v45 }
 0xbb9   :  { %869 = vrot.lane.b32.xlu0 %v861_v3, %s1552_s18 }
 0xc2b   :  { %v870_v4 = vpop.permute.xlu0 %869 }
 0xc2c   :  { %1341 = vmatmul.mubr.msk.f32.vlgmr.msra.gmra.mrb[8].mxu1 %vm180_vm2, %v870_v4 }
 0xcff   :  { %v939_v9 = vpop.f32.mrb[8].mxu1 }
 0xd00   :  { %v940_v10 = vadd.f32 %v939_v9, %v867_v7  ;;  %v1342_v12 = vpop.f32.mrb[9].mxu1 }
 0xd02   :  { %v1021_v11 = vadd.f32 %v1353_v0, %v940_v10  ;;  %v1016_v13 = vadd.f32 %v1015_v5, %v940_v10 }
 0xd04   :  { %v1025_v15 = vmul.f32 %v1021_v11, %v1699_v33  ;;  %v1024_v16 = vmul.f32 %v1016_v13, %v1699_v33 }
 0xd06   :  { %1465 = vtanh.f32 %v1025_v15 }
 0xd07   :  { %1467 = vtanh.f32 %v1024_v16 }
 0xd10   :  { %v1466_v18 = vpop.eup %1465 }
 0xd11   :  { %v1468_v17 = vpop.eup %1467  ;;  %v1029_v20 = vmul.f32 %v1466_v18, %v1699_v33 }
 0xd12   :  { %v1028_v8 = vmul.f32 %v1468_v17, %v1699_v33 }
 0xd13   :  { %v1031_v22 = vadd.f32 %v1029_v20, %v1705_v39 }
 0xd14   :  { %v1030_v23 = vadd.f32 %v1028_v8, %v1705_v39  ;;  %v81_v39 = vld [vmem:[%s1826_s5] sm:$0xff] }
 0xd15   :  { %1038 = vrot.lane.b32.xlu0 %v1031_v22, %s1551_s6  ;;  %v1033_v28 = vmul.f32 %v1031_v22, %v855_v49  ;;  %v1430_v37 = vpack.c.bf16 %v82_v35, %v81_v39 }
 0xd16   :  { %1036 = vrot.lane.b32.xlu1 %v1030_v23, %s1551_s6  ;;  %v1032_v30 = vmul.f32 %v1030_v23, %v855_v49 }
 0xd17   :  { %1431 = vmatprep.subr.bf16.mxu1 %v1430_v37 }
 0xd18   :  { %1433 = vmatpush3.bf16.msra.mxu1 %v1430_v37 }
 0xd19   :  { %1435 = vmatprep.subr.bf16.mxu1 %v1434_v40 }
 0xd1c   :  { %1437 = vmatpush3.bf16.msra.mxu1 %v1434_v40 }
 0xd87   :  { %v1039_v14 = vpop.permute.xlu0 %1038 }
 0xd88   :  { %v1043_v24 = vmul.f32 %v1039_v14, %v1031_v22  ;;  %v1037_v25 = vpop.permute.xlu1 %1036 }
 0xd89   :  { %v1042_v27 = vmul.f32 %v1037_v25, %v1030_v23 }
 0xd8a   :  { %1048 = vrot.lane.b32.xlu0 %v1043_v24, %s1552_s18 }
 0xd8b   :  { %1046 = vrot.lane.b32.xlu1 %v1042_v27, %s1552_s18 }
 0xdfc   :  { %v1049_v29 = vpop.permute.xlu0 %1048 }
 0xdfd   :  { %v1053_v33 = vadd.f32 %v1049_v29, %v1033_v28  ;;  %v1047_v32 = vpop.permute.xlu1 %1046 }
 0xdfe   :  { %v1052_v34 = vadd.f32 %v1047_v32, %v1032_v30 }
 0xdff   :  { %1469 = vtanh.f32 %v1053_v33 }
 0xe00   :  { %1471 = vtanh.f32 %v1052_v34 }
 0xe09   :  { %v1470_v41 = vpop.eup %1469 }
 0xe0a   :  { %v1472_v26 = vpop.eup %1471  ;;  %1060 = vrot.lane.b32.xlu0 %v1470_v41, %s1551_s6 }
 0xe0b   :  { %1058 = vrot.lane.b32.xlu1 %v1472_v26, %s1551_s6 }
 0xe7c   :  { %v1061_v42 = vpop.permute.xlu0 %1060 }
 0xe7d   :  { %v1065_v43 = vmul.f32 %v1061_v42, %v1031_v22  ;;  %v1059_v44 = vpop.permute.xlu1 %1058 }
 0xe7e   :  { %v1064_v45 = vmul.f32 %v1059_v44, %v1030_v23 }
 0xe7f   :  { %1074 = vrot.lane.b32.xlu0 %v1065_v43, %s1552_s18 }
 0xe80   :  { %1072 = vrot.lane.b32.xlu1 %v1064_v45, %s1552_s18 }
 0xef1   :  { %v1075_v46 = vpop.permute.xlu0 %1074 }
 0xef2   :  { %v1073_v47 = vpop.permute.xlu1 %1072 }
 0xef3   :  { %1362 = vmatprep.mubr.msk.f32.mxu1 %vm180_vm2, %v1073_v47 }
 0xef4   :  { %1363 = vmatmul.mubr.msk.f32.vlgmr.msra.gmra.mrb[10].mxu1 %vm180_vm2, %v1075_v46 }
 0xfc7   :  { %v1364_v49 = vpop.f32.mrb[10].mxu1 }
 0xfc8   :  { %v1152_v50 = vadd.f32 %v1364_v49, %v1069_v48  ;;  %v1146_v31 = vpop.f32.mrb[11].mxu1 }
 0xfc9   :  { %v1147_v51 = vadd.f32 %v1146_v31, %v1069_v48 }
 0xfca   :  { %1157 = vst.msk [vmem:[%s1828_s7 + $0x8] sm:$0xff] %vm1155_vm3, %v1152_v50 }
 0xfcb   :  { %1156 = vst.msk [vmem:[%s1828_s7] sm:$0xff] %vm1155_vm3, %v1147_v51 }
 0xfcc   :  { %1162 = vsyncpa [#allocation3], 1 }
 0xfcd   :  { %1163 = vsyncpa [#allocation5], 1 }

</bundles_post_ra>
